<compile_context>
chip_gen: v7x
topology: tpu7x:2x2x1
jax: 0.10.0
libtpu: 0.0.40
codegen_flags: <defaults>
</compile_context>

<pallas_src>
import functools

import jax
import jax.numpy as jnp
from jax.experimental import pallas as pl
from jax.experimental.pallas import tpu as pltpu


_VMEM_TARGET_BYTES = 36 * 1024 * 1024   # working-set target; leaves headroom on v7x (64 MiB)


def _round_up(x, m):
    return (x + m - 1) // m * m


def _conv1d_kernel(xm_ref, xh_ref, w_ref, b_ref, o_ref, *,
                   K, C_in, stride, dilation, tile_l, fold):
    # xm_ref: (1, stride, C_in, TILE_L)   main window (time on lanes, phase-decimated)
    # xh_ref: (1, stride, C_in, H_PAD)    right halo (first H_PAD columns of next tile)
    # w_ref : (C_out_p, K*C_in) if fold else (K, C_out_p, C_in)
    # b_ref : (C_out_p, 1) float32
    # o_ref : (1, C_out_p, TILE_L)
    window = jnp.concatenate([xm_ref[0], xh_ref[0]], axis=-1)   # (stride, C_in, TILE_L+H)

    def tap(k):
        # output col t needs padded-input index t*stride + k*dilation == phase p, col t+q
        p = (k * dilation) % stride
        q = (k * dilation) // stride
        return window[p, :, q:q + tile_l]                        # (C_in, TILE_L)

    if fold:
        # Single deep contraction: (C_out_p, K*C_in) @ (K*C_in, TILE_L).
        rhs = tap(0) if K == 1 else jnp.concatenate([tap(k) for k in range(K)], axis=0)
        acc = jnp.dot(w_ref[...], rhs, preferred_element_type=jnp.float32)
    else:
        # Tiny / unaligned C_in: register-accumulated per-tap dots (avoids an
        # unaligned sublane concat; these layers are memory-bound anyway).
        acc = jnp.dot(w_ref[0], tap(0), preferred_element_type=jnp.float32)
        for k in range(1, K):
            acc = acc + jnp.dot(w_ref[k], tap(k), preferred_element_type=jnp.float32)

    # Fused f32 bias epilogue, one lane-dense store.
    o_ref[0] = (acc + b_ref[...]).astype(o_ref.dtype)


def conv1d_pallas(x, weight, bias=None, *, stride=1, padding=0, dilation=1,
                  tile_l=512, compute_dtype=None):
    """x: (B, C_in, L); weight: (C_out, C_in, K); bias: (C_out,) -> (B, C_out, L_out)."""
    B, C_in, L = x.shape
    C_out, C_in_w, K = weight.shape
    assert C_in == C_in_w
    assert stride >= 1 and dilation >= 1 and padding >= 0
    if bias is None:
        bias = jnp.zeros((C_out,), jnp.float32)

    cdt = jnp.dtype(x.dtype) if compute_dtype is None else jnp.dtype(compute_dtype)
    out_dtype = x.dtype
    itm_c = cdt.itemsize
    itm_o = jnp.dtype(out_dtype).itemsize

    L_pad = L + 2 * padding
    span = dilation * (K - 1) + 1
    assert L_pad >= span, "non-positive output length"
    L_out = (L_pad - span) // stride + 1

    # --- static tiling decisions ---------------------------------------------------
    q_max = (dilation * (K - 1)) // stride          # max right-halo rows past the tile
    H_PAD = 128 * max(1, pl.cdiv(q_max, 128))       # halo block width, lane-aligned
    C_out_p = _round_up(C_out, 8)                   # sublane padding only (not 128 lanes)
    sub = 8 * (4 // itm_c)                          # sublane packing of the compute dtype
    fold = (C_in % sub == 0)                        # aligned K-fold into one contraction
    # TODO(synk): on v5e (4x128 MXU) a per-tap path for C_in==128 avoids the concat
    # with no depth loss; chip-specific branching is skipped here for simplicity.

    w_elems = C_out_p * K * C_in

    def vmem_bytes(tl):                             # double-buffered working set + temps
        x_blk = stride * C_in * (tl + H_PAD) * itm_c
        o_blk = C_out_p * tl * itm_o
        fixed = w_elems * itm_c + C_out_p * 4
        temps = x_blk + K * C_in * tl * itm_c + C_out_p * tl * 4
        return 2 * (x_blk + o_blk + fixed) + temps

    TILE_L = _round_up(_round_up(min(tile_l, max(L_out, 1)), 128), H_PAD)
    while TILE_L > H_PAD and vmem_bytes(TILE_L) > _VMEM_TARGET_BYTES:
        TILE_L -= H_PAD
    n_l = pl.cdiv(L_out, TILE_L)
    L_out_p = n_l * TILE_L
    M_p = L_out_p + H_PAD                           # decimated rows incl. the last halo
    halo_per_tile = TILE_L // H_PAD                 # exact: TILE_L is a multiple of H_PAD
    assert L_out - 1 + q_max < M_p                  # last valid read stays in bounds
    assert (L_out - 1) * stride + dilation * (K - 1) <= L_pad - 1

    # --- wrapper glue: one pad (+ one transpose iff stride > 1); no output transposes ---
    total = M_p * stride
    x_k = jnp.pad(x, ((0, 0), (0, 0), (padding, padding + total - L_pad)))
    # x_ph[b, p, c, m] = x_padded[b, c, m*stride + p]; for stride==1 this is a pure reshape.
    x_ph = x_k.reshape(B, C_in, M_p, stride).transpose(0, 3, 1, 2).astype(cdt)

    if fold:
        # w2[o, k*C_in + c] = weight[o, c, k]
        w_k = jnp.transpose(weight, (0, 2, 1)).reshape(C_out, K * C_in)
        w_k = jnp.pad(w_k, ((0, C_out_p - C_out), (0, 0))).astype(cdt)
        w_spec = pl.BlockSpec((C_out_p, K * C_in), lambda b, l: (0, 0))
    else:
        # w3[k, o, c] = weight[o, c, k]
        w_k = jnp.pad(jnp.transpose(weight, (2, 0, 1)),
                      ((0, 0), (0, C_out_p - C_out), (0, 0))).astype(cdt)
        w_spec = pl.BlockSpec((K, C_out_p, C_in), lambda b, l: (0, 0, 0))
    b_k = jnp.pad(bias.astype(jnp.float32), (0, C_out_p - C_out)).reshape(C_out_p, 1)

    kernel = functools.partial(_conv1d_kernel, K=K, C_in=C_in, stride=stride,
                               dilation=dilation, tile_l=TILE_L, fold=fold)

    flops = 2 * B * L_out * K * C_in * C_out
    bytes_accessed = (B * n_l * stride * C_in * (TILE_L + H_PAD) * itm_c      # x (+ halo re-read)
                      + w_elems * itm_c + C_out_p * 4
                      + B * C_out_p * L_out_p * itm_o)
    vmem_limit = int(min(max(vmem_bytes(TILE_L) * 3 // 2 + (1 << 20), 16 << 20), 60 << 20))

    out = pl.pallas_call(
        kernel,
        out_shape=jax.ShapeDtypeStruct((B, C_out_p, L_out_p), out_dtype),
        grid_spec=pltpu.PrefetchScalarGridSpec(
            num_scalar_prefetch=0,
            grid=(B, n_l),
            in_specs=[
                # main window: streams one TILE_L slab of x per step (VMEM is O(TILE_L))
                pl.BlockSpec((1, stride, C_in, TILE_L), lambda b, l: (b, 0, 0, l)),
                # right halo: first H_PAD columns of the *next* tile
                pl.BlockSpec((1, stride, C_in, H_PAD),
                             lambda b, l: (b, 0, 0, (l + 1) * halo_per_tile)),
                # weights / bias are grid-constant (pl.Buffered(1) would halve their VMEM;
                # default double-buffering kept for robustness, accounted in the budget)
                w_spec,
                pl.BlockSpec((C_out_p, 1), lambda b, l: (0, 0)),
            ],
            out_specs=pl.BlockSpec((1, C_out_p, TILE_L), lambda b, l: (b, 0, l)),
        ),
        compiler_params=pltpu.CompilerParams(
            dimension_semantics=("parallel", "parallel"),
            vmem_limit_bytes=vmem_limit),
        cost_estimate=pl.CostEstimate(flops=flops, transcendentals=0,
                                      bytes_accessed=bytes_accessed),
    )(x_ph, x_ph, w_k, b_k)

    # Already channels-first like the PyTorch module; just strip padding.
    return out[:, :C_out, :L_out]


def conv1d_reference(x, weight, bias, *, stride=1, padding=0, dilation=1):
    """Pure-JAX mirror of the PyTorch custom_conv1d (unfold + einsum)."""
    B, C_in, L = x.shape
    C_out, _, K = weight.shape
    if padding > 0:
        x = jnp.pad(x, ((0, 0), (0, 0), (padding, padding)))
    L_pad = x.shape[-1]
    L_out = (L_pad - (dilation * (K - 1) + 1)) // stride + 1
    idx = (jnp.arange(L_out) * stride)[:, None] + jnp.arange(K) * dilation   # (L_out, K)
    x_unfold = x[:, :, idx]                                                  # (B, C_in, L_out, K)
    out = jnp.einsum('bisk,oik->bos', x_unfold, weight,
                     precision=jax.lax.Precision.HIGHEST)
    return out + bias[None, :, None]


if __name__ == "__main__":
    key = jax.random.PRNGKey(0)
    ks = jax.random.split(key, 9)

    def check(out, ref, tol):
        assert out.shape == ref.shape, (out.shape, ref.shape)
        o32 = out.astype(jnp.float32)
        err = float(jnp.max(jnp.abs(o32 - ref)))
        assert jnp.allclose(o32, ref, atol=tol, rtol=tol), err

    # Case 1: tiny channels (per-tap register-accumulation path), dilated + padded,
    # stride=1, single L tile; f32 end to end.
    B, C_in, L, C_out, K = 2, 4, 16, 6, 3
    x = jax.random.normal(ks[0], (B, C_in, L), dtype=jnp.float32)
    w = jax.random.normal(ks[1], (C_out, C_in, K), dtype=jnp.float32)
    b = jax.random.normal(ks[2], (C_out,), dtype=jnp.float32)
    out = jax.block_until_ready(conv1d_pallas(x, w, b, stride=1, padding=2, dilation=2))
    ref = conv1d_reference(x, w, b, stride=1, padding=2, dilation=2)
    check(out, ref, 2e-2)

    # Case 2: sublane-aligned channels (K folded into one K*C_in-deep contraction),
    # stride=2 (phase-decimated path), L_out > TILE_L so the right-halo block carries
    # real data across the tile boundary.
    B2, C_in2, L2, C_out2, K2 = 2, 16, 384, 10, 3
    x2 = jax.random.normal(ks[3], (B2, C_in2, L2), dtype=jnp.float32)
    w2 = jax.random.normal(ks[4], (C_out2, C_in2, K2), dtype=jnp.float32)
    b2 = jax.random.normal(ks[5], (C_out2,), dtype=jnp.float32)
    out2 = jax.block_until_ready(
        conv1d_pallas(x2, w2, b2, stride=2, padding=1, dilation=1, tile_l=128))
    ref2 = conv1d_reference(x2, w2, b2, stride=2, padding=1, dilation=1)
    check(out2, ref2, 2e-2)

    # Case 3: bf16 activations / weights (f32 accumulation in the MXU), default tiling.
    x3 = jax.random.normal(ks[6], (2, 4, 16), dtype=jnp.float32)
    w3 = jax.random.normal(ks[7], (6, 4, 3), dtype=jnp.float32)
    b3 = jax.random.normal(ks[8], (6,), dtype=jnp.float32)
    out3 = jax.block_until_ready(
        conv1d_pallas(x3.astype(jnp.bfloat16), w3.astype(jnp.bfloat16), b3,
                      stride=1, padding=1, dilation=1))
    ref3 = conv1d_reference(x3.astype(jnp.bfloat16).astype(jnp.float32),
                            w3.astype(jnp.bfloat16).astype(jnp.float32), b3,
                            stride=1, padding=1, dilation=1)
    check(out3, ref3, 6e-2)

    print("KERNEL_OK")
</pallas_src>

<mosaic_0001>
module attributes {stable_mosaic.version = 11 : i64} {
  func.func @_conv1d_kernel(%arg0: i32, %arg1: i32, %arg2: memref<1x1x4x128xf32, #tpu.memory_space<vmem>>, %arg3: memref<1x1x4x128xf32, #tpu.memory_space<vmem>>, %arg4: memref<3x8x4xf32, #tpu.memory_space<vmem>>, %arg5: memref<8x1xf32, #tpu.memory_space<vmem>>, %arg6: memref<1x8x128xf32, #tpu.memory_space<vmem>>) attributes {dimension_semantics = [#tpu.dimension_semantics<parallel>, #tpu.dimension_semantics<parallel>], iteration_bounds = array<i64: 2, 1>, scalar_prefetch = 0 : i64, scratch_operands = 0 : i64, tpu.core_type = #tpu.core_type<tc>, window_params = [{transform_indices = @transform_0, window_bounds = array<i64: 1, 1, 4, 128>}, {transform_indices = @transform_1, window_bounds = array<i64: 1, 1, 4, 128>}, {pipeline_mode = #tpu.pipeline_mode<synchronous>, transform_indices = @transform_2, window_bounds = array<i64: 3, 8, 4>}, {pipeline_mode = #tpu.pipeline_mode<synchronous>, transform_indices = @transform_3, window_bounds = array<i64: 8, 1>}, {transform_indices = @transform_4, window_bounds = array<i64: 1, 8, 128>}]} {
    %c0 = arith.constant 0 : index
    %c0_0 = arith.constant 0 : index
    %c0_1 = arith.constant 0 : index
    %c0_2 = arith.constant 0 : index
    %0 = vector.load %arg2[%c0, %c0_0, %c0_1, %c0_2] : memref<1x1x4x128xf32, #tpu.memory_space<vmem>>, vector<1x1x4x128xf32>
    %1 = vector.shape_cast %0 : vector<1x1x4x128xf32> to vector<1x4x128xf32>
    %c0_3 = arith.constant 0 : index
    %c0_4 = arith.constant 0 : index
    %c0_5 = arith.constant 0 : index
    %c0_6 = arith.constant 0 : index
    %2 = vector.load %arg3[%c0_3, %c0_4, %c0_5, %c0_6] : memref<1x1x4x128xf32, #tpu.memory_space<vmem>>, vector<1x1x4x128xf32>
    %3 = vector.shape_cast %2 : vector<1x1x4x128xf32> to vector<1x4x128xf32>
    %4 = tpu.concatenate %1, %3 in 2 : vector<1x4x128xf32>, vector<1x4x128xf32> -> vector<1x4x256xf32>
    %c0_7 = arith.constant 0 : index
    %c0_8 = arith.constant 0 : index
    %c0_9 = arith.constant 0 : index
    %5 = vector.load %arg4[%c0_7, %c0_8, %c0_9] : memref<3x8x4xf32, #tpu.memory_space<vmem>>, vector<1x8x4xf32>
    %6 = vector.shape_cast %5 : vector<1x8x4xf32> to vector<8x4xf32>
    %7 = vector.extract_strided_slice %4 {offsets = [0, 0, 0], sizes = [1, 4, 128], strides = [1, 1, 1]} : vector<1x4x256xf32> to vector<1x4x128xf32>
    %8 = vector.shape_cast %7 : vector<1x4x128xf32> to vector<4x128xf32>
    %cst = arith.constant dense<0.000000e+00> : vector<8x128xf32>
    %9 = tpu.matmul %6, %8, %cst {dimension_numbers = #tpu.dot_dimension_numbers<[1], [0], [0], [1], [0, 0, 1, 1], [], []>} : vector<8x4xf32>, vector<4x128xf32>, vector<8x128xf32> -> vector<8x128xf32>
    %c1 = arith.constant 1 : index
    %c0_10 = arith.constant 0 : index
    %c0_11 = arith.constant 0 : index
    %10 = vector.load %arg4[%c1, %c0_10, %c0_11] : memref<3x8x4xf32, #tpu.memory_space<vmem>>, vector<1x8x4xf32>
    %11 = vector.shape_cast %10 : vector<1x8x4xf32> to vector<8x4xf32>
    %12 = vector.extract_strided_slice %4 {offsets = [0, 0, 2], sizes = [1, 4, 128], strides = [1, 1, 1]} : vector<1x4x256xf32> to vector<1x4x128xf32>
    %13 = vector.shape_cast %12 : vector<1x4x128xf32> to vector<4x128xf32>
    %cst_12 = arith.constant dense<0.000000e+00> : vector<8x128xf32>
    %14 = tpu.matmul %11, %13, %cst_12 {dimension_numbers = #tpu.dot_dimension_numbers<[1], [0], [0], [1], [0, 0, 1, 1], [], []>} : vector<8x4xf32>, vector<4x128xf32>, vector<8x128xf32> -> vector<8x128xf32>
    %15 = arith.addf %9, %14 : vector<8x128xf32>
    %c2 = arith.constant 2 : index
    %c0_13 = arith.constant 0 : index
    %c0_14 = arith.constant 0 : index
    %16 = vector.load %arg4[%c2, %c0_13, %c0_14] : memref<3x8x4xf32, #tpu.memory_space<vmem>>, vector<1x8x4xf32>
    %17 = vector.shape_cast %16 : vector<1x8x4xf32> to vector<8x4xf32>
    %18 = vector.extract_strided_slice %4 {offsets = [0, 0, 4], sizes = [1, 4, 128], strides = [1, 1, 1]} : vector<1x4x256xf32> to vector<1x4x128xf32>
    %19 = vector.shape_cast %18 : vector<1x4x128xf32> to vector<4x128xf32>
    %cst_15 = arith.constant dense<0.000000e+00> : vector<8x128xf32>
    %20 = tpu.matmul %17, %19, %cst_15 {dimension_numbers = #tpu.dot_dimension_numbers<[1], [0], [0], [1], [0, 0, 1, 1], [], []>} : vector<8x4xf32>, vector<4x128xf32>, vector<8x128xf32> -> vector<8x128xf32>
    %21 = arith.addf %15, %20 : vector<8x128xf32>
    %c0_16 = arith.constant 0 : index
    %c0_17 = arith.constant 0 : index
    %22 = vector.load %arg5[%c0_16, %c0_17] : memref<8x1xf32, #tpu.memory_space<vmem>>, vector<8x1xf32>
    %23 = vector.broadcast %22 : vector<8x1xf32> to vector<8x128xf32>
    %24 = arith.addf %21, %23 : vector<8x128xf32>
    %c0_18 = arith.constant 0 : index
    %c0_19 = arith.constant 0 : index
    %c0_20 = arith.constant 0 : index
    %25 = vector.load %arg6[%c0_18, %c0_19, %c0_20] : memref<1x8x128xf32, #tpu.memory_space<vmem>>, vector<1x8x128xf32>
    %26 = vector.shape_cast %25 : vector<1x8x128xf32> to vector<8x128xf32>
    %27 = vector.shape_cast %24 : vector<8x128xf32> to vector<1x8x128xf32>
    tpu.vector_store %arg6[%c0_18, %c0_19, %c0_20], %27 {strides = array<i32>} : memref<1x8x128xf32, #tpu.memory_space<vmem>>, vector<1x8x128xf32>,
    return
  }
  func.func @transform_0(%arg0: i32, %arg1: i32) -> (i32, i32, i32, i32) {
    %c0_i32 = arith.constant 0 : i32
    %c0_i32_0 = arith.constant 0 : i32
    %c0_i32_1 = arith.constant 0 : i32
    return %arg0, %c0_i32, %c0_i32_0, %arg1 : i32, i32, i32, i32
  }
  func.func @transform_1(%arg0: i32, %arg1: i32) -> (i32, i32, i32, i32) {
    %c1_i32 = arith.constant 1 : i32
    %0 = arith.addi %arg1, %c1_i32 : i32
    %c1_i32_0 = arith.constant 1 : i32
    %1 = arith.muli %0, %c1_i32_0 : i32
    %c0_i32 = arith.constant 0 : i32
    %c0_i32_1 = arith.constant 0 : i32
    %c0_i32_2 = arith.constant 0 : i32
    return %arg0, %c0_i32, %c0_i32_1, %1 : i32, i32, i32, i32
  }
  func.func @transform_2(%arg0: i32, %arg1: i32) -> (i32, i32, i32) {
    %c0_i32 = arith.constant 0 : i32
    %c0_i32_0 = arith.constant 0 : i32
    %c0_i32_1 = arith.constant 0 : i32
    %c0_i32_2 = arith.constant 0 : i32
    return %c0_i32, %c0_i32_0, %c0_i32_1 : i32, i32, i32
  }
  func.func @transform_3(%arg0: i32, %arg1: i32) -> (i32, i32) {
    %c0_i32 = arith.constant 0 : i32
    %c0_i32_0 = arith.constant 0 : i32
    %c0_i32_1 = arith.constant 0 : i32
    return %c0_i32, %c0_i32_0 : i32, i32
  }
  func.func @transform_4(%arg0: i32, %arg1: i32) -> (i32, i32, i32) {
    %c0_i32 = arith.constant 0 : i32
    %c0_i32_0 = arith.constant 0 : i32
    return %arg0, %c0_i32, %arg1 : i32, i32, i32
  }
}

</mosaic_0001>

<bundles_post_ra>
// kernel: tpu_custom_call.1
= control target key start
LH: loop header
LB: loop body
LE: loop exit
PB: predicated region body
PF: predicated region fallthrough
CT: control target
= control target key end

     0   :  { %9 = vsyncpa [#allocation3], 0  ;;  %s978_s0 = inlined_call_operand.vmem [shape: f32[2,1,4,256], index: 0, kind: input, shape index: {}]   ;;  %s979_s1 = inlined_call_operand.vmem [shape: f32[2,1,4,256], index: 1, kind: input, shape index: {}]   ;;  %s980_s2 = inlined_call_operand.vmem [shape: f32[3,8,4], index: 2, kind: input, shape index: {}]   ;;  %s981_s3 = inlined_call_operand.vmem [shape: f32[8,1], index: 3, kind: input, shape index: {}]   ;;  %s982_s4 = inlined_call_operand.hbm [shape: f32[2,8,128], index: 4, kind: output, shape index: {}]  }
   0x1   :  { %11 = vsyncpa [#allocation3 + $0x1], 0  ;;  %s842_s15 = smov 0   ;;  %s844_s16 = smov 0  }
   0x2   :  { %s846_s17 = smov 0   ;;  %s848_s18 = smov 0  }
   0x3   :  { %s850_s19 = smov 0   ;;  %s852_s20 = smov 0  }
   0x4 LB: > { %s623_s21 = sadd.s32 4294967295, %s809_s20   ;;  %s624_s22 = sadd.s32 4294967294, %s809_s20   ;;  %s809_s20 = sphi %s852_s20, %s17_s20   ;;  %s805_s19 = sphi %s850_s19, %s989_s19   ;;  %s801_s18 = sphi %s848_s18, %s988_s18   ;;  %s797_s17 = sphi %s846_s17, %s987_s17   ;;  %s793_s16 = sphi %s844_s16, %s986_s16   ;;  %s789_s15 = sphi %s842_s15, %s985_s15  }
   0x5   : > { %s29_s23 = sadd.s32 1, %s805_s19  ;;  %s138_s24 = sadd.s32 1, %s797_s17 }
   0x6   : > { %p31_p0 = scmp.ge.s32.totalorder %s29_s23, 2  ;;  %p148_p1 = scmp.ne.s32.totalorder %s797_s17, %s793_s16 }
   0x7   : > { %p149_p2 = scmp.eq.s32.totalorder %s623_s21, 1  ;;  %p154_p3 = scmp.ne.s32.totalorder %s793_s16, %s789_s15 }
   0x8   : > { %s991_s23 = smov (%p31_p0, %s29_s23), 0  ;;  %p155_p5 = scmp.eq.s32.totalorder %s624_s22, 1 }
   0x9   : > { %p882_p4 = por %p149_p2, %p148_p1  ;;  %s133_s26 = ssub.s32 %s805_s19, %s991_s23 }
   0xa   : > { %p627_p6 = scmp.ge.s32.totalorder %s809_s20, 1  ;;  %p136_p7 = scmp.eq.s32.totalorder %s133_s26, 0 }
   0xb   : > { %p889_p8 = por %p155_p5, %p154_p3  ;;  %p203_p9 = scmp.lt.s32.totalorder %s809_s20, 3 }
   0xc   : > { %s895_s28 = scalar_select %p136_p7, %s797_s17, %s138_s24  }
   0xd   : > { %p204_p10 = pnand %p627_p6, %p203_p9 }
   0xe   : > { %p241_p11 = scmp.lt.s32.totalorder (!%p204_p10), %s801_s18, 1  ;;  %v811_v0 = vmov (!%p204_p10), 0.0   ;;  %vm812_vm0 = vmmov (!%p204_p10), 0   ;;  %vm276_vm1 = vcmask (!%p204_p10), 1043456   ;;  %v813_v1 = vmov (!%p204_p10), 0   ;;  %v261_v3 = vld [vmem:[%s980_s2] sm:$0xff] (!%p204_p10) }
   0xf   : > { %207 = sbr.rel (%p204_p10) target bundleno = 382 (0x17e), region = 36  ;;  %655 = vmatprep.subr.mxu0 (!%p204_p10), %v811_v0  ;;  %660 = vmatprep.subr.mxu1 (!%p204_p10), %v811_v0  ;;  %vm272_vm2 = vcmask (!%p204_p10), 31744   ;;  %s814_s14 = smov (!%p204_p10), 124   ;;  %v508_v5 = vld [vmem:[%s981_s3] sm:$0xff] (!%p204_p10)  ;;  %vm270_vm3 = vcmask (!%p204_p10), 1031168   ;;  %vm430_vm4 = vcmask (!%p204_p10), 1014784  }
  0x10   : > { %657 = vmatprep.mubr.msk.f32.mxu0 (!%p204_p10), %vm812_vm0, %v811_v0  ;;  %662 = vmatprep.mubr.msk.f32.mxu1 (!%p204_p10), %vm812_vm0, %v811_v0  ;;  %s815_s21 = smov (!%p204_p10), 126   ;;  %v633_v10 = vld [vmem:[%s980_s2 + $0x8] sm:$0xff] (!%p204_p10)  ;;  %v638_v13 = vld [vmem:[%s980_s2 + $0x10] sm:$0xff] (!%p204_p10)  ;;  %s238_s6 = sand.u32 (!%p204_p10), 1, %s793_s16  }
  0x11   : > { %730 = vset.pattern.permute.xlu0 (!%p204_p10), %v813_v1 }
  0x16   : > { %s242_s29 = scalar_select %p241_p11, %s801_s18, 1 }
  0x18   : > { %s645_s30 = sshll.u32 %s242_s29, 3 }
  0x19   : > { %s248_s7 = scalar_lea.vmem %s978_s0, %s645_s30  ;;  %s647_s8 = sadd.s32 4, %s645_s30 }
  0x1a   : > { %v259_v2 = vld [vmem:[%s248_s7] sm:$0xf]  ;;  %s257_s11 = scalar_lea.vmem %s979_s1, %s647_s8  ;;  %s628_s7 = sshll.u32 %s238_s6, 3 }
  0x1b   : > { %426 = vrot.lane.b32.xlu1 %v259_v2, %s814_s14  ;;  %266 = vrot.lane.b32.xlu0 %v259_v2, %s815_s21  ;;  %v260_v4 = vld [vmem:[%s257_s11] sm:$0xf]  ;;  %s642_s8 = sshll.u32 %s801_s18, 7  ;;  %s240_s9 = scalar_lea.vmem [#allocation2], %s628_s7 }
  0x1c   : > { %661 = vmatpush3.msk.msra.mxu1 %vm276_vm1, %v259_v2  ;;  %s531_s10 = sshll.u32 %s240_s9, 4  ;;  %s931_s13 = scalar_lea.hbm %s982_s4, %s642_s8  ;;  %s933_s10 = int_to_ptr.vmem [resolvable:$true] %s531_s10 }
  0x1d   : > { %663 = vmatmul.mubr.msk.f32.vlgmr.msra.gmra.mrb[0].mxu1 %vm272_vm2, %v261_v3  ;;  %s816_s18 = smov [#allocation2]  }
  0x1e   : > { %s735_s22 = sshll.u32 %s816_s18, 4  ;;  %s736_s22 = int_to_ptr.vmem [resolvable:$false] %s735_s22 }
  0x1f   : > { %428 = vrot.lane.b32.xlu1 %v260_v4, %s814_s14  ;;  %268 = vrot.lane.b32.xlu0 %v260_v4, %s815_s21  ;;  %s517_s14 = scalar_lea.sflag [#allocation3], %s238_s6  ;;  %s731_s21 = scalar_lea.vmem %s933_s10, 128 }
  0x20   : > { %p732_p12 = scmp.ne.s32.totalorder %s933_s10, %s731_s21  ;;  %s737_s24 = scalar_lea.vmem %s736_s22, 256 }
  0x21   : > { %p738_p1 = scmp.lt.s32.totalorder %s933_s10, %s736_s22  ;;  %p739_p2 = scmp.lt.s32.totalorder %s737_s24, %s731_s21 }
  0x22   : > { %p733_p13 = pnand %p732_p12, %p882_p4 }
  0x23   : > { %511 = vperm.xlu0 %730, %v508_v5   ;;  %p740_p3 = por %p739_p2, %p738_p1 }
  0x24   : > { %p734_p0 = pneg %p733_p13 }
  0x26   : > { %p741_p5 = pnand %p740_p3, %p734_p0 }
  0x8d   : > { %v427_v6 = vpop.permute.xlu1 %426  ;;  %v267_v7 = vpop.permute.xlu0 %266 }
  0x91   : > { %v429_v8 = vpop.permute.xlu1 %428  ;;  %v269_v9 = vpop.permute.xlu0 %268 }
  0x92   : > { %v271_v11 = vsel %vm270_vm3, %v267_v7, %v269_v9  ;;  %v431_v12 = vsel %vm430_vm4, %v427_v6, %v429_v8 }
  0x93   : > { %656 = vmatpush3.msk.msra.mxu0 %vm276_vm1, %v271_v11 }
  0x94   : > { %658 = vmatmul.mubr.msk.f32.vlgmr.msra.gmra.mrb[0].mxu0 %vm272_vm2, %v633_v10  ;;  %665 = vmatprep.subr.mxu0 %v811_v0 }
  0x95   : > { %666 = vmatpush3.msk.msra.mxu0 %vm276_vm1, %v431_v12  ;;  %667 = vmatprep.mubr.msk.f32.mxu0 %vm812_vm0, %v811_v0 }
  0x98   : > { %668 = vmatmul.mubr.msk.f32.vlgmr.msra.gmra.mrb[2].mxu0 %vm272_vm2, %v638_v13 }
  0xa2   : > { %v512_v20 = vpop.permute.xlu0 %511 }
  0xf0   : > { %v420_v14 = vpop.f32.mrb[0].mxu1 }
  0xf1   : > { %v664_v15 = vpop.f32.mrb[1].mxu1 }
 0x167   : > { %v345_v16 = vpop.f32.mrb[0].mxu0 }
 0x168   : > { %v659_v17 = vpop.f32.mrb[1].mxu0  ;;  %v421_v18 = vadd.f32 %v420_v14, %v345_v16 }
 0x16b   : > { %v503_v19 = vpop.f32.mrb[2].mxu0 }
 0x16c   : > { %v507_v21 = vadd.f32 %v503_v19, %v421_v18  ;;  %v669_v22 = vpop.f32.mrb[3].mxu0 }
 0x16e   : > { %v514_v23 = vadd.f32 %v512_v20, %v507_v21 }
 0x170   : > { %515 = vst [vmem:[%s240_s9] sm:$0xff] %v514_v23 }
 0x171   : > { %744 = shalt.err (!%p741_p5)
}
 0x172   : > { %s745_s26 = scalar_lea.hbm %s931_s13, 128  ;;  %s749_s5 = scalar_lea.hbm %s982_s4, 256 }
 0x173   : > { %p746_p6 = scmp.ne.s32.totalorder %s931_s13, %s745_s26  ;;  %p750_p10 = scmp.lt.u32.totalorder %s931_s13, %s982_s4 }
 0x174   : > { %p751_p11 = scmp.lt.u32.totalorder %s749_s5, %s745_s26  ;;  %p753_p13 = scmp.lt.u32.totalorder %s745_s26, %s931_s13 }
 0x175   : > { %p747_p7 = pnand %p746_p6, %p882_p4 }
 0x176   : > { %p752_p12 = por %p751_p11, %p750_p10 }
 0x177   : > { %p748_p9 = pneg %p747_p7 }
 0x178   : > { %p754_p0 = por %p753_p13, %p752_p12 }
 0x17a   : > { %p755_p1 = pnand %p754_p0, %p748_p9 }
 0x17c   : > { %758 = shalt.err (!%p755_p1)
}
 0x17d   : > { %670 = dma.vmem_to_hbm [thread:$0]  (%p882_p4), %s933_s10, 128, %s931_s13, %s517_s14  }
 0x17e PF: > { %p676_p2 = scmp.ge.s32.totalorder %s809_s20, 2  ;;  %s543_s8 = sand.u32 1, %s789_s15  }
 0x17f   : > { %s544_s9 = scalar_lea.sflag [#allocation3], %s543_s8 }
 0x180   : > { %p673_p3 = pnand %p676_p2, %p889_p8 }
 0x182   : > { %784 = dma.done.wait (!%p673_p3), %s544_s9, 128  }
 0x183   : > { %786 = vsyncadd (!%p673_p3), %s544_s9, 4294967168  ;;  %s17_s20 = sadd.s32 1, %s809_s20   ;;  %s985_s15 = smov %s793_s16 }
 0x184   : > { %p14_p5 = scmp.ge.s32.totalorder %s17_s20, 4   ;;  %s986_s16 = smov %s797_s17 }
 0x185   : > { %s987_s17 = smov %s895_s28  ;;  %s988_s18 = smov %s805_s19 }
 0x186   : > { %s989_s19 = smov %s991_s23  ;;  %16 = sbr.rel (!%p14_p5) target bundleno = 4 (0x4), region = 76 }
 0x18d   :  { %549 = vsyncpa [#allocation3], 1 }
 0x18e   :  { %551 = vsyncpa [#allocation3 + $0x1], 1 }

</bundles_post_ra>
